<compile_context>
chip_gen: v7x
topology: tpu7x:2x2x1
jax: 0.10.0
libtpu: 0.0.40
codegen_flags: <defaults>
</compile_context>

<pallas_src>
import math

import jax
import jax.numpy as jnp
from jax.experimental import pallas as pl
from jax.experimental.pallas import tpu as pltpu


def _round_up(x, m):
    return (x + m - 1) // m * m


def gcn_conv_kernel(x_ref, w_ref, b_ref, o_ref):
    # x_ref: (TILE_M, K) f32     w_ref: (K, N) f32 (resident across grid steps)
    # b_ref, o_ref: (TILE_M, N) f32
    o_ref[...] = (
        jnp.dot(x_ref[...], w_ref[...], preferred_element_type=jnp.float32)
        + b_ref[...]
    )


def gcn_conv_mlp(x, weight, bias, *, tile_m=512):
    """GCNConv_mlp forward: x @ weight + bias.

    x: (num_nodes, num_features) f32
    weight: (num_features, out_channels) f32
    bias: (num_nodes, out_channels) f32
    returns (num_nodes, out_channels) f32
    """
    m, k = x.shape
    k2, n = weight.shape
    assert k == k2, (k, k2)
    assert bias.shape == (m, n), bias.shape

    # Sublane-aligned row tile, capped at the (padded) row count.
    tile_m = min(tile_m, _round_up(m, 8))
    # Keep >= 2 grid steps when possible so the "parallel" M axis can shard across
    # v7x's 2 TensorCores (harmless on v5e/v6e: a couple of extra cheap steps).
    if pl.cdiv(m, tile_m) < 2 and m > 8:
        tile_m = min(tile_m, _round_up(pl.cdiv(m, 2), 8))

    grid_m = pl.cdiv(m, tile_m)
    m_pad = grid_m * tile_m

    x_in, b_in = x, bias
    if m_pad != m:
        # Only pay the padding pass when the row count is not tile-aligned.
        x_in = jnp.zeros((m_pad, k), x.dtype).at[:m, :].set(x)
        b_in = jnp.zeros((m_pad, n), bias.dtype).at[:m, :].set(bias)

    out = pl.pallas_call(
        gcn_conv_kernel,
        out_shape=jax.ShapeDtypeStruct((m_pad, n), jnp.float32),
        grid=(grid_m,),
        in_specs=[
            pl.BlockSpec((tile_m, k), lambda i: (i, 0)),   # x: advances with grid
            pl.BlockSpec((k, n), lambda i: (0, 0)),        # weight: resident (one DMA)
            pl.BlockSpec((tile_m, n), lambda i: (i, 0)),   # bias: per-node, advances
        ],
        out_specs=pl.BlockSpec((tile_m, n), lambda i: (i, 0)),
        compiler_params=pltpu.CompilerParams(
            dimension_semantics=("parallel",)),            # v7x: shard rows over 2 TCs
    )(x_in, weight, b_in)

    if m_pad != m:
        out = out[:m, :]
    return out


def reference_gcn_conv(x, weight, bias):
    """Plain-JAX f32 reference matching the torch forward exactly."""
    return jnp.dot(x, weight, preferred_element_type=jnp.float32) + bias


if __name__ == "__main__":
    # Small shapes consistent with the module: 256 nodes, 64 features, 32 out channels.
    num_nodes, num_features, out_channels = 256, 64, 32

    key = jax.random.PRNGKey(0)
    kx, kw, kb = jax.random.split(key, 3)

    # glorot init for the weight (matches reset_parameters); the spec zeros the bias,
    # but we use small random values here so the bias-add path is actually exercised.
    stdv = math.sqrt(6.0 / (num_features + out_channels))
    x = jax.random.normal(kx, (num_nodes, num_features), jnp.float32)
    weight = jax.random.uniform(kw, (num_features, out_channels), jnp.float32, -stdv, stdv)
    bias = 0.1 * jax.random.normal(kb, (num_nodes, out_channels), jnp.float32)

    out = gcn_conv_mlp(x, weight, bias)
    out = jax.block_until_ready(out)

    ref = reference_gcn_conv(x, weight, bias)
    assert out.shape == (num_nodes, out_channels), out.shape
    max_err = float(jnp.max(jnp.abs(out - ref)))
    assert jnp.allclose(out, ref, atol=1e-5, rtol=1e-5), max_err

    print("KERNEL_OK")
</pallas_src>

<mosaic_0001>
module attributes {stable_mosaic.version = 11 : i64} {
  func.func @gcn_conv_kernel(%arg0: i32, %arg1: memref<128x64xf32, #tpu.memory_space<vmem>>, %arg2: memref<64x32xf32, #tpu.memory_space<vmem>>, %arg3: memref<128x32xf32, #tpu.memory_space<vmem>>, %arg4: memref<128x32xf32, #tpu.memory_space<vmem>>) attributes {dimension_semantics = [#tpu.dimension_semantics<parallel>], iteration_bounds = array<i64: 2>, scalar_prefetch = 0 : i64, scratch_operands = 0 : i64, tpu.core_type = #tpu.core_type<tc>, window_params = [{transform_indices = @transform_0, window_bounds = array<i64: 128, 64>}, {pipeline_mode = #tpu.pipeline_mode<synchronous>, transform_indices = @transform_1, window_bounds = array<i64: 64, 32>}, {transform_indices = @transform_2, window_bounds = array<i64: 128, 32>}, {transform_indices = @transform_3, window_bounds = array<i64: 128, 32>}]} {
    %c0 = arith.constant 0 : index
    %c0_0 = arith.constant 0 : index
    %0 = vector.load %arg1[%c0, %c0_0] : memref<128x64xf32, #tpu.memory_space<vmem>>, vector<128x64xf32>
    %c0_1 = arith.constant 0 : index
    %c0_2 = arith.constant 0 : index
    %1 = vector.load %arg2[%c0_1, %c0_2] : memref<64x32xf32, #tpu.memory_space<vmem>>, vector<64x32xf32>
    %cst = arith.constant dense<0.000000e+00> : vector<128x32xf32>
    %2 = tpu.matmul %0, %1, %cst {dimension_numbers = #tpu.dot_dimension_numbers<[1], [0], [0], [1], [0, 0, 1, 1], [], []>} : vector<128x64xf32>, vector<64x32xf32>, vector<128x32xf32> -> vector<128x32xf32>
    %c0_3 = arith.constant 0 : index
    %c0_4 = arith.constant 0 : index
    %3 = vector.load %arg3[%c0_3, %c0_4] : memref<128x32xf32, #tpu.memory_space<vmem>>, vector<128x32xf32>
    %4 = arith.addf %2, %3 : vector<128x32xf32>
    %c0_5 = arith.constant 0 : index
    %c0_6 = arith.constant 0 : index
    %5 = vector.load %arg4[%c0_5, %c0_6] : memref<128x32xf32, #tpu.memory_space<vmem>>, vector<128x32xf32>
    tpu.vector_store %arg4[%c0_5, %c0_6], %4 {strides = array<i32>} : memref<128x32xf32, #tpu.memory_space<vmem>>, vector<128x32xf32>,
    return
  }
  func.func @transform_0(%arg0: i32) -> (i32, i32) {
    %c0_i32 = arith.constant 0 : i32
    %c0_i32_0 = arith.constant 0 : i32
    return %arg0, %c0_i32 : i32, i32
  }
  func.func @transform_1(%arg0: i32) -> (i32, i32) {
    %c0_i32 = arith.constant 0 : i32
    %c0_i32_0 = arith.constant 0 : i32
    %c0_i32_1 = arith.constant 0 : i32
    return %c0_i32, %c0_i32_0 : i32, i32
  }
  func.func @transform_2(%arg0: i32) -> (i32, i32) {
    %c0_i32 = arith.constant 0 : i32
    %c0_i32_0 = arith.constant 0 : i32
    return %arg0, %c0_i32 : i32, i32
  }
  func.func @transform_3(%arg0: i32) -> (i32, i32) {
    %c0_i32 = arith.constant 0 : i32
    %c0_i32_0 = arith.constant 0 : i32
    return %arg0, %c0_i32 : i32, i32
  }
}

</mosaic_0001>

<bundles_post_ra>
// kernel: tpu_custom_call.1
= control target key start
LH: loop header
LB: loop body
LE: loop exit
PB: predicated region body
PF: predicated region fallthrough
CT: control target
= control target key end

     0   :  { %s668_s12 = smov 0   ;;  %s803_s0 = inlined_call_operand.vmem [shape: f32[256,64], index: 0, kind: input, shape index: {}]   ;;  %s804_s1 = inlined_call_operand.vmem [shape: f32[64,32], index: 1, kind: input, shape index: {}]   ;;  %s805_s2 = inlined_call_operand.vmem [shape: f32[256,32], index: 2, kind: input, shape index: {}]   ;;  %s806_s3 = inlined_call_operand.vmem [shape: f32[256,32], index: 3, kind: output, shape index: {}]  }
   0x1 LB: > { %s515_s13 = sadd.s32 4294967295, %s646_s12   ;;  %p519_p0 = scmp.ge.s32.totalorder %s646_s12, 1  ;;  %s646_s12 = sphi %s668_s12, %s13_s12  }
   0x2   : > { %p149_p1 = scmp.lt.s32.totalorder %s646_s12, 3 }
   0x4   : > { %p150_p2 = pnand %p519_p0, %p149_p1 }
   0x5   : > { %v212_v0 = vld [vmem:[%s804_s1] sm:$0xff] (!%p150_p2)  ;;  %v213_v1 = vld [vmem:[%s804_s1 + $0x8] sm:$0xff] (!%p150_p2)  ;;  %v214_v2 = vld [vmem:[%s804_s1 + $0x10] sm:$0xff] (!%p150_p2)  ;;  %s520_s20 = sshll.u32 (!%p150_p2), %s515_s13, 4  ;;  %vm236_vm0 = vcmask (!%p150_p2), 523264   ;;  %vm430_vm1 = vcmask (!%p150_p2), 261120  }
   0x6   : > { %153 = sbr.rel (%p150_p2) target bundleno = 253 (0xfd), region = 32  ;;  %v608_v3 = vpack.c.bf16 (!%p150_p2), %v213_v1, %v212_v0  ;;  %v215_v4 = vld [vmem:[%s804_s1 + $0x18] sm:$0xff] (!%p150_p2)  ;;  %p179_p3 = scmp.lt.s32.totalorder (!%p150_p2), %s520_s20, 31  ;;  %v216_v6 = vld [vmem:[%s804_s1 + $0x20] sm:$0xff] (!%p150_p2)  ;;  %v217_v7 = vld [vmem:[%s804_s1 + $0x28] sm:$0xff] (!%p150_p2) }
   0x7   : > { %v612_v5 = vpack.c.bf16 (!%p150_p2), %v215_v4, %v214_v2  ;;  %v616_v8 = vpack.c.bf16 (!%p150_p2), %v217_v7, %v216_v6  ;;  %v218_v9 = vld [vmem:[%s804_s1 + $0x30] sm:$0xff] (!%p150_p2)  ;;  %v219_v10 = vld [vmem:[%s804_s1 + $0x38] sm:$0xff] (!%p150_p2) }
   0x8   : > { %609 = vmatprep.subr.bf16.mxu0 (!%p150_p2), %v608_v3  ;;  %624 = vmatprep.subr.bf16.mxu1 (!%p150_p2), %v608_v3  ;;  %v620_v13 = vpack.c.bf16 (!%p150_p2), %v219_v10, %v218_v9 }
   0x9   : > { %611 = vmatpush3.bf16.msra.mxu0 (!%p150_p2), %v608_v3  ;;  %628 = vmatpush3.bf16.msra.mxu1 (!%p150_p2), %v608_v3 }
   0xa   : > { %613 = vmatprep.subr.bf16.mxu0 (!%p150_p2), %v612_v5  ;;  %625 = vmatprep.subr.bf16.mxu1 (!%p150_p2), %v612_v5 }
   0xd   : > { %s808_s20 = smov (!%p179_p3, %s520_s20), 31  ;;  %615 = vmatpush3.bf16.msra.mxu0 %v612_v5  ;;  %629 = vmatpush3.bf16.msra.mxu1 %v612_v5 }
   0xe   : > { %s694_s27 = sshll.u32 %s808_s20, 3  ;;  %617 = vmatprep.subr.bf16.mxu0 %v616_v8  ;;  %626 = vmatprep.subr.bf16.mxu1 %v616_v8 }
   0xf   : > { %s706_s7 = scalar_lea.vmem %s803_s0, %s694_s27  ;;  %s744_s10 = scalar_lea.vmem %s805_s2, %s694_s27 }
  0x10   : > { %v196_v11 = vld [vmem:[%s706_s7] sm:$0xff]  ;;  %v197_v14 = vld [vmem:[%s706_s7 + $0x8] sm:$0xff]  ;;  %v198_v16 = vld [vmem:[%s706_s7 + $0x10] sm:$0xff]  ;;  %s754_s14 = scalar_lea.vmem %s806_s3, %s694_s27 }
  0x11   : > { %v204_v12 = vld [vmem:[%s706_s7 + $0x40] sm:$0xff]  ;;  %584 = vmatprep.mubr.msk.f32.mxu0 %vm236_vm0, %v196_v11  ;;  %619 = vmatpush3.bf16.msra.mxu0 %v616_v8  ;;  %v205_v15 = vld [vmem:[%s706_s7 + $0x48] sm:$0xff]  ;;  %v206_v17 = vld [vmem:[%s706_s7 + $0x50] sm:$0xff] }
  0x12   : > { %596 = vmatprep.mubr.msk.f32.mxu1 %vm236_vm0, %v204_v12  ;;  %630 = vmatpush3.bf16.msra.mxu1 %v616_v8  ;;  %v199_v18 = vld [vmem:[%s706_s7 + $0x18] sm:$0xff]  ;;  %v200_v20 = vld [vmem:[%s706_s7 + $0x20] sm:$0xff]  ;;  %v201_v22 = vld [vmem:[%s706_s7 + $0x28] sm:$0xff] }
  0x13   : > { %621 = vmatprep.subr.bf16.mxu0 %v620_v13  ;;  %627 = vmatprep.subr.bf16.mxu1 %v620_v13  ;;  %v207_v19 = vld [vmem:[%s706_s7 + $0x58] sm:$0xff]  ;;  %v208_v21 = vld [vmem:[%s706_s7 + $0x60] sm:$0xff]  ;;  %v209_v23 = vld [vmem:[%s706_s7 + $0x68] sm:$0xff] }
  0x14   : > { %v202_v24 = vld [vmem:[%s706_s7 + $0x30] sm:$0xff]  ;;  %v203_v26 = vld [vmem:[%s706_s7 + $0x38] sm:$0xff]  ;;  %v221_v28 = vld [vmem:[%s744_s10 + $0x8] sm:$0xff] }
  0x15   : > { %623 = vmatpush3.bf16.msra.mxu0 %v620_v13  ;;  %v210_v25 = vld [vmem:[%s706_s7 + $0x70] sm:$0xff]  ;;  %v211_v27 = vld [vmem:[%s706_s7 + $0x78] sm:$0xff]  ;;  %v229_v29 = vld [vmem:[%s744_s10 + $0x48] sm:$0xff] }
  0x16   : > { %631 = vmatpush3.bf16.msra.mxu1 %v620_v13  ;;  %v220_v30 = vld [vmem:[%s744_s10] sm:$0xff]  ;;  %v223_v40 = vld [vmem:[%s744_s10 + $0x18] sm:$0xff]  ;;  %v222_v42 = vld [vmem:[%s744_s10 + $0x10] sm:$0xff] }
  0x17   : > { %v228_v31 = vld [vmem:[%s744_s10 + $0x40] sm:$0xff]  ;;  %v231_v41 = vld [vmem:[%s744_s10 + $0x58] sm:$0xff]  ;;  %v230_v43 = vld [vmem:[%s744_s10 + $0x50] sm:$0xff] }
  0x18   : > { %585 = vmatmul.mubr.msk.f32.vlgmr.msra.gmra.mrb[0].mxu0 %vm236_vm0, %v197_v14  ;;  %v225_v52 = vld [vmem:[%s744_s10 + $0x28] sm:$0xff]  ;;  %v224_v54 = vld [vmem:[%s744_s10 + $0x20] sm:$0xff]  ;;  %v227_v0 = vld [vmem:[%s744_s10 + $0x38] sm:$0xff] }
  0x19   : > { %597 = vmatmul.mubr.msk.f32.vlgmr.msra.gmra.mrb[0].mxu1 %vm236_vm0, %v205_v15  ;;  %587 = vmatprep.mubr.msk.f32.mxu0 %vm236_vm0, %v198_v16  ;;  %v233_v53 = vld [vmem:[%s744_s10 + $0x68] sm:$0xff]  ;;  %v232_v55 = vld [vmem:[%s744_s10 + $0x60] sm:$0xff]  ;;  %v235_v1 = vld [vmem:[%s744_s10 + $0x78] sm:$0xff] }
  0x1a   : > { %599 = vmatprep.mubr.msk.f32.mxu1 %vm236_vm0, %v206_v17  ;;  %v226_v2 = vld [vmem:[%s744_s10 + $0x30] sm:$0xff] }
  0x1b   : > { %v234_v3 = vld [vmem:[%s744_s10 + $0x70] sm:$0xff] }
  0x1c   : > { %588 = vmatmul.mubr.msk.f32.gmra.mrb[2].mxu0 %vm236_vm0, %v199_v18 }
  0x1d   : > { %600 = vmatmul.mubr.msk.f32.gmra.mrb[2].mxu1 %vm236_vm0, %v207_v19  ;;  %590 = vmatprep.mubr.msk.f32.mxu0 %vm236_vm0, %v200_v20 }
  0x1e   : > { %602 = vmatprep.mubr.msk.f32.mxu1 %vm236_vm0, %v208_v21 }
  0x20   : > { %591 = vmatmul.mubr.msk.f32.gmra.mrb[4].mxu0 %vm236_vm0, %v201_v22 }
  0x21   : > { %603 = vmatmul.mubr.msk.f32.gmra.mrb[4].mxu1 %vm236_vm0, %v209_v23  ;;  %593 = vmatprep.mubr.msk.f32.mxu0 %vm236_vm0, %v202_v24 }
  0x22   : > { %605 = vmatprep.mubr.msk.f32.mxu1 %vm236_vm0, %v210_v25 }
  0x24   : > { %594 = vmatmul.mubr.msk.f32.gmra.mrb[6].mxu0 %vm236_vm0, %v203_v26 }
  0x25   : > { %606 = vmatmul.mubr.msk.f32.gmra.mrb[6].mxu1 %vm236_vm0, %v211_v27 }
  0xeb   : > { %v586_v32 = vpop.f32.mrb[0].mxu0 }
  0xec   : > { %v598_v33 = vpop.f32.mrb[0].mxu1  ;;  %v357_v34 = vadd.f32 %v586_v32, %v221_v28  ;;  %v351_v36 = vpop.f32.mrb[1].mxu0 }
  0xed   : > { %v397_v35 = vadd.f32 %v598_v33, %v229_v29  ;;  %v391_v37 = vpop.f32.mrb[1].mxu1  ;;  %v352_v38 = vadd.f32 %v351_v36, %v220_v30 }
  0xee   : > { %v392_v39 = vadd.f32 %v391_v37, %v228_v31  ;;  %432 = vst.msk [vmem:[%s754_s14 + $0x8] sm:$0xff] %vm430_vm1, %v357_v34 }
  0xef   : > { %440 = vst.msk [vmem:[%s754_s14 + $0x48] sm:$0xff] %vm430_vm1, %v397_v35  ;;  %431 = vst.msk [vmem:[%s754_s14] sm:$0xff] %vm430_vm1, %v352_v38  ;;  %v589_v44 = vpop.f32.mrb[2].mxu0 }
  0xf0   : > { %439 = vst.msk [vmem:[%s754_s14 + $0x40] sm:$0xff] %vm430_vm1, %v392_v39  ;;  %v601_v45 = vpop.f32.mrb[2].mxu1  ;;  %v367_v46 = vadd.f32 %v589_v44, %v223_v40  ;;  %v361_v48 = vpop.f32.mrb[3].mxu0 }
  0xf1   : > { %v407_v47 = vadd.f32 %v601_v45, %v231_v41  ;;  %v401_v49 = vpop.f32.mrb[3].mxu1  ;;  %v362_v50 = vadd.f32 %v361_v48, %v222_v42 }
  0xf2   : > { %v402_v51 = vadd.f32 %v401_v49, %v230_v43  ;;  %434 = vst.msk [vmem:[%s754_s14 + $0x18] sm:$0xff] %vm430_vm1, %v367_v46 }
  0xf3   : > { %442 = vst.msk [vmem:[%s754_s14 + $0x58] sm:$0xff] %vm430_vm1, %v407_v47  ;;  %433 = vst.msk [vmem:[%s754_s14 + $0x10] sm:$0xff] %vm430_vm1, %v362_v50  ;;  %v592_v56 = vpop.f32.mrb[4].mxu0 }
  0xf4   : > { %441 = vst.msk [vmem:[%s754_s14 + $0x50] sm:$0xff] %vm430_vm1, %v402_v51  ;;  %v604_v57 = vpop.f32.mrb[4].mxu1  ;;  %v377_v58 = vadd.f32 %v592_v56, %v225_v52  ;;  %v371_v60 = vpop.f32.mrb[5].mxu0 }
  0xf5   : > { %v417_v59 = vadd.f32 %v604_v57, %v233_v53  ;;  %v411_v61 = vpop.f32.mrb[5].mxu1  ;;  %v372_v62 = vadd.f32 %v371_v60, %v224_v54 }
  0xf6   : > { %v412_v63 = vadd.f32 %v411_v61, %v232_v55  ;;  %436 = vst.msk [vmem:[%s754_s14 + $0x28] sm:$0xff] %vm430_vm1, %v377_v58 }
  0xf7   : > { %444 = vst.msk [vmem:[%s754_s14 + $0x68] sm:$0xff] %vm430_vm1, %v417_v59  ;;  %435 = vst.msk [vmem:[%s754_s14 + $0x20] sm:$0xff] %vm430_vm1, %v372_v62  ;;  %v595_v4 = vpop.f32.mrb[6].mxu0 }
  0xf8   : > { %443 = vst.msk [vmem:[%s754_s14 + $0x60] sm:$0xff] %vm430_vm1, %v412_v63  ;;  %v607_v5 = vpop.f32.mrb[6].mxu1  ;;  %v387_v6 = vadd.f32 %v595_v4, %v227_v0  ;;  %v381_v8 = vpop.f32.mrb[7].mxu0 }
  0xf9   : > { %v427_v7 = vadd.f32 %v607_v5, %v235_v1  ;;  %v421_v9 = vpop.f32.mrb[7].mxu1  ;;  %v382_v10 = vadd.f32 %v381_v8, %v226_v2 }
  0xfa   : > { %v422_v11 = vadd.f32 %v421_v9, %v234_v3  ;;  %438 = vst.msk [vmem:[%s754_s14 + $0x38] sm:$0xff] %vm430_vm1, %v387_v6 }
  0xfb   : > { %446 = vst.msk [vmem:[%s754_s14 + $0x78] sm:$0xff] %vm430_vm1, %v427_v7  ;;  %437 = vst.msk [vmem:[%s754_s14 + $0x30] sm:$0xff] %vm430_vm1, %v382_v10 }
  0xfc   : > { %445 = vst.msk [vmem:[%s754_s14 + $0x70] sm:$0xff] %vm430_vm1, %v422_v11 }
  0xfd PF: > { %s13_s12 = sadd.s32 1, %s646_s12  }
  0xfe   : > { %p10_p4 = scmp.ge.s32.totalorder %s13_s12, 4  }
 0x100   :  { %12 = sbr.rel (!%p10_p4) target bundleno = 1 (0x1), region = 65 }

</bundles_post_ra>
